<compile_context>
chip_gen: v5e
topology: v5e:2x2
jax: 0.10.0
libtpu: 0.0.40
codegen_flags: <defaults>
</compile_context>

<pallas_src>
import jax
import jax.numpy as jnp
from jax.experimental import pallas as pl
from jax.experimental.pallas import tpu as pltpu


# ----------------------------------------------------------------------------
# Kernel
# ----------------------------------------------------------------------------
def _fused_block_kernel(x_ref, w1_ref, b1_ref, w2_ref, b2_ref,
                        upk_ref, dnk_ref, o_ref):
    """out = relu( conv2(relu(conv1(x))) + x ) for a slab of NB images.

    x_ref  : (M, WC)      M = NB*H rows of lane-flattened NHWC activation, f32
    wX_ref : (3*WC, WC)   per-kh banded conv+BN weights stacked along K, bf16
    bX_ref : (1, WC)      folded BN bias tiled across W, f32
    upk/dnk: (M, 1)       0/1 masks zeroing the first/last row of each image
    o_ref  : (M, WC)
    """
    x = x_ref[...]                                   # (M, WC) f32
    m = x.shape[0]
    upk = upk_ref[...]                               # (M, 1) f32
    dnk = dnk_ref[...]                               # (M, 1) f32

    def conv3x3(a, w_ref_):
        # 3x3 conv, padding=1.  kw taps + W-edge zero padding are folded into
        # the banded weight; kh taps are handled with XLU row rolls whose
        # cross-image / H-edge rows are zeroed by the masks.
        up = pltpu.roll(a, 1, axis=0) * upk          # row h-1
        dn = pltpu.roll(a, m - 1, axis=0) * dnk      # row h+1
        a3 = jnp.concatenate([up, a, dn], axis=1)    # (M, 3*WC) f32
        a3 = a3.astype(jnp.bfloat16)                 # single cast per conv
        return jnp.dot(a3, w_ref_[...],
                       preferred_element_type=jnp.float32)   # (M, WC) f32

    # conv1 + BN + ReLU  (intermediate never touches HBM)
    h1 = jnp.maximum(conv3x3(x, w1_ref) + b1_ref[...], 0.0)
    # conv2 + BN, residual add (f32 identity), final ReLU
    h2 = conv3x3(h1, w2_ref) + b2_ref[...] + x
    o_ref[...] = jnp.maximum(h2, 0.0).astype(o_ref.dtype)


def _pick_images_per_step(n, h, target_rows=128):
    """Raise matmul M to ~target_rows, but keep >=2 grid steps when N >= 2 so
    both v7x TensorCores get work."""
    nb = max(1, min(n, max(1, target_rows // h)))
    while n % nb:
        nb -= 1
    if n >= 2 and n // nb < 2:
        nb = max(1, n // 2)
        while n % nb:
            nb -= 1
    return nb


def fused_basic_block(x_flat, w1_kband, b1_row, w2_kband, b2_row,
                      *, images_per_step=None):
    """x_flat: (N, H, W*C) f32 (NHWC with W and C flattened onto lanes)."""
    N, H, WC = x_flat.shape
    WC_out = w1_kband.shape[1]
    if WC != WC_out or w2_kband.shape[1] != WC:
        raise ValueError("residual add requires inplanes == planes")
    if w1_kband.shape[0] != 3 * WC or w2_kband.shape[0] != 3 * WC:
        raise ValueError("banded weights must have K = 3 * W * C")
    if WC % 128 != 0:
        raise ValueError("W*C must be a multiple of 128 for lane-dense layout")

    NB = images_per_step or _pick_images_per_step(N, H)
    assert N % NB == 0
    M = NB * H                                        # rows per grid step
    if M % 8 != 0:
        raise ValueError("NB*H must be a multiple of 8 (sublane tiling)")

    x2d = x_flat.reshape(N * H, WC)

    # 0/1 masks marking which rows of the slab are NOT an image's first / last
    # row (built once per trace; shared by every grid step and both convs).
    r = jnp.arange(M, dtype=jnp.int32) % H
    upk = (r != 0).astype(jnp.float32)[:, None]       # (M, 1)
    dnk = (r != H - 1).astype(jnp.float32)[:, None]   # (M, 1)

    out2d = pl.pallas_call(
        _fused_block_kernel,
        out_shape=jax.ShapeDtypeStruct((N * H, WC), x_flat.dtype),
        grid_spec=pltpu.PrefetchScalarGridSpec(
            num_scalar_prefetch=0,
            grid=(N // NB,),
            in_specs=[
                pl.BlockSpec((M, WC), lambda g: (g, 0)),
                pl.BlockSpec((3 * WC, WC), lambda g: (0, 0)),   # reused, no re-DMA
                pl.BlockSpec((1, WC), lambda g: (0, 0)),
                pl.BlockSpec((3 * WC, WC), lambda g: (0, 0)),
                pl.BlockSpec((1, WC), lambda g: (0, 0)),
                pl.BlockSpec((M, 1), lambda g: (0, 0)),
                pl.BlockSpec((M, 1), lambda g: (0, 0)),
            ],
            out_specs=pl.BlockSpec((M, WC), lambda g: (g, 0)),
        ),
        compiler_params=pltpu.CompilerParams(
            dimension_semantics=("parallel",)),
    )(x2d, w1_kband, b1_row, w2_kband, b2_row, upk, dnk)
    return out2d.reshape(N, H, WC)


# ----------------------------------------------------------------------------
# Host-side weight preparation (done ONCE, outside the forward pass)
# ----------------------------------------------------------------------------
def _fold_bn(w_oihw, gamma, beta, mean, var, eps=1e-5):
    scale = gamma / jnp.sqrt(var + eps)                 # (Cout,)
    w_fold = w_oihw * scale[:, None, None, None]        # (Cout, Cin, 3, 3)
    bias = beta - mean * scale                          # (Cout,)
    return w_fold, bias


def _banded_weights(w_fold, W):
    """(Cout, Cin, 3, 3) -> (3*W*Cin, W*Cout) banded matrix, kh taps on K.

    band[kh*W*Cin + wi*Cin + ci, wo*Cout + co] = w_fold[co, ci, kh, wi-wo+1]
    when 0 <= wi-wo+1 <= 2, else 0.  kw taps and W-edge zero padding are folded
    into the band; kh taps become the three K-blocks matching [up | mid | dn].
    """
    Cout, Cin = w_fold.shape[0], w_fold.shape[1]
    w_k = jnp.transpose(w_fold, (2, 3, 1, 0))           # (kh, kw, Cin, Cout)
    wi = jnp.arange(W)[:, None]
    wo = jnp.arange(W)[None, :]
    kw = wi - wo + 1                                     # (W, W)
    valid = (kw >= 0) & (kw <= 2)
    band = w_k[:, jnp.clip(kw, 0, 2)]                    # (3, W, W, Cin, Cout)
    band = jnp.where(valid[None, :, :, None, None], band, 0.0)
    band = jnp.transpose(band, (0, 1, 3, 2, 4))          # (3, wi, ci, wo, co)
    return band.reshape(3 * W * Cin, W * Cout)


def prepare_basic_block(params, W, weight_dtype=jnp.bfloat16):
    """BN fold + K-stacked banded-weight build (bf16 MXU operands, f32 bias)."""
    w1f, b1 = _fold_bn(params["w1"], params["bn1_gamma"], params["bn1_beta"],
                       params["bn1_mean"], params["bn1_var"])
    w2f, b2 = _fold_bn(params["w2"], params["bn2_gamma"], params["bn2_beta"],
                       params["bn2_mean"], params["bn2_var"])
    return {
        "w1_kband": _banded_weights(w1f, W).astype(weight_dtype),
        "b1_row": jnp.tile(b1, W)[None, :].astype(jnp.float32),
        "w2_kband": _banded_weights(w2f, W).astype(weight_dtype),
        "b2_row": jnp.tile(b2, W)[None, :].astype(jnp.float32),
    }


# ----------------------------------------------------------------------------
# Forward passes
# ----------------------------------------------------------------------------
def basic_block_forward_flat(x_flat, prep):
    """Lane-flattened NHWC forward (N, H, W*C) -> (N, H, W*C)."""
    return fused_basic_block(x_flat, prep["w1_kband"], prep["b1_row"],
                             prep["w2_kband"], prep["b2_row"])


@jax.jit
def basic_block_forward(x_nchw, prep):
    """BasicBlock.forward with PyTorch NCHW I/O (layout conversion at the edge)."""
    N, C, H, W = x_nchw.shape
    x_flat = jnp.transpose(x_nchw, (0, 2, 3, 1)).reshape(N, H, W * C)
    out_flat = basic_block_forward_flat(x_flat, prep)
    return jnp.transpose(out_flat.reshape(N, H, W, C), (0, 3, 1, 2))


# ----------------------------------------------------------------------------
# Synthetic params + pure-JAX reference
# ----------------------------------------------------------------------------
def init_basic_block_params(key, inplanes, planes):
    k1, k2, k3, k4, k5, k6 = jax.random.split(key, 6)
    params = {}
    params["w1"] = jax.random.normal(k1, (planes, inplanes, 3, 3), jnp.float32) * 0.1
    params["bn1_gamma"] = 1.0 + 0.1 * jax.random.normal(k2, (planes,), jnp.float32)
    params["bn1_beta"] = 0.1 * jax.random.normal(k3, (planes,), jnp.float32)
    params["bn1_mean"] = jnp.zeros((planes,), jnp.float32)
    params["bn1_var"] = jnp.ones((planes,), jnp.float32)
    params["w2"] = jax.random.normal(k4, (planes, planes, 3, 3), jnp.float32) * 0.1
    params["bn2_gamma"] = 1.0 + 0.1 * jax.random.normal(k5, (planes,), jnp.float32)
    params["bn2_beta"] = 0.1 * jax.random.normal(k6, (planes,), jnp.float32)
    params["bn2_mean"] = jnp.zeros((planes,), jnp.float32)
    params["bn2_var"] = jnp.ones((planes,), jnp.float32)
    return params


def _reference_forward(x_nchw, params):
    """Pure-JAX reference (lax.conv, f32) for correctness checking."""
    def conv_bn(x, w, gamma, beta, mean, var, relu):
        y = jax.lax.conv_general_dilated(
            x, w, window_strides=(1, 1), padding=((1, 1), (1, 1)),
            dimension_numbers=("NCHW", "OIHW", "NCHW"))
        scale = gamma / jnp.sqrt(var + 1e-5)
        y = y * scale[None, :, None, None] + (beta - mean * scale)[None, :, None, None]
        return jnp.maximum(y, 0.0) if relu else y

    out = conv_bn(x_nchw, params["w1"], params["bn1_gamma"], params["bn1_beta"],
                  params["bn1_mean"], params["bn1_var"], relu=True)
    out = conv_bn(out, params["w2"], params["bn2_gamma"], params["bn2_beta"],
                  params["bn2_mean"], params["bn2_var"], relu=False)
    return jnp.maximum(out + x_nchw, 0.0)


if __name__ == "__main__":
    key = jax.random.PRNGKey(0)
    k_x, k_p = jax.random.split(key)

    # inplanes == planes, stride=1, downsample=None.
    # W*C = 128 -> lane-dense; N=16 -> 8 images/step (M = 128 matmul rows) and
    # 2 "parallel" grid steps (both v7x TensorCores busy).
    N, C, H, W = 16, 8, 16, 16
    x = jax.random.normal(k_x, (N, C, H, W), jnp.float32)
    params = init_basic_block_params(k_p, inplanes=C, planes=C)
    prep = prepare_basic_block(params, W)

    out = basic_block_forward(x, prep)
    out = jax.block_until_ready(out)

    ref = _reference_forward(x, params)
    assert out.shape == (N, C, H, W)
    max_err = float(jnp.max(jnp.abs(out - ref)))
    # bf16 MXU operands (f32 accumulate) => mixed-precision inference tolerance.
    assert jnp.allclose(out, ref, atol=5e-2, rtol=5e-2), \
        f"Pallas output mismatch vs reference (max abs err {max_err})"

    print("KERNEL_OK")
</pallas_src>

<mosaic_0001>
module attributes {stable_mosaic.version = 11 : i64} {
  func.func @_fused_block_kernel(%arg0: i32, %arg1: memref<128x128xf32, #tpu.memory_space<vmem>>, %arg2: memref<384x128xbf16, #tpu.memory_space<vmem>>, %arg3: memref<1x128xf32, #tpu.memory_space<vmem>>, %arg4: memref<384x128xbf16, #tpu.memory_space<vmem>>, %arg5: memref<1x128xf32, #tpu.memory_space<vmem>>, %arg6: memref<128x1xf32, #tpu.memory_space<vmem>>, %arg7: memref<128x1xf32, #tpu.memory_space<vmem>>, %arg8: memref<128x128xf32, #tpu.memory_space<vmem>>) attributes {dimension_semantics = [#tpu.dimension_semantics<parallel>], iteration_bounds = array<i64: 2>, scalar_prefetch = 0 : i64, scratch_operands = 0 : i64, tpu.core_type = #tpu.core_type<tc>, window_params = [{transform_indices = @transform_0, window_bounds = array<i64: 128, 128>}, {pipeline_mode = #tpu.pipeline_mode<synchronous>, transform_indices = @transform_1, window_bounds = array<i64: 384, 128>}, {pipeline_mode = #tpu.pipeline_mode<synchronous>, transform_indices = @transform_2, window_bounds = array<i64: 1, 128>}, {pipeline_mode = #tpu.pipeline_mode<synchronous>, transform_indices = @transform_3, window_bounds = array<i64: 384, 128>}, {pipeline_mode = #tpu.pipeline_mode<synchronous>, transform_indices = @transform_4, window_bounds = array<i64: 1, 128>}, {pipeline_mode = #tpu.pipeline_mode<synchronous>, transform_indices = @transform_5, window_bounds = array<i64: 128, 1>}, {pipeline_mode = #tpu.pipeline_mode<synchronous>, transform_indices = @transform_6, window_bounds = array<i64: 128, 1>}, {transform_indices = @transform_7, window_bounds = array<i64: 128, 128>}]} {
    %c0 = arith.constant 0 : index
    %c0_0 = arith.constant 0 : index
    %0 = vector.load %arg1[%c0, %c0_0] : memref<128x128xf32, #tpu.memory_space<vmem>>, vector<128x128xf32>
    %c0_1 = arith.constant 0 : index
    %c0_2 = arith.constant 0 : index
    %1 = vector.load %arg6[%c0_1, %c0_2] : memref<128x1xf32, #tpu.memory_space<vmem>>, vector<128x1xf32>
    %c0_3 = arith.constant 0 : index
    %c0_4 = arith.constant 0 : index
    %2 = vector.load %arg7[%c0_3, %c0_4] : memref<128x1xf32, #tpu.memory_space<vmem>>, vector<128x1xf32>
    %c1_i32 = arith.constant 1 : i32
    %3 = tpu.dynamic_rotate %0 by %c1_i32 dim 0 : vector<128x128xf32>, i32 -> vector<128x128xf32>
    %4 = vector.broadcast %1 : vector<128x1xf32> to vector<128x128xf32>
    %5 = arith.mulf %3, %4 : vector<128x128xf32>
    %c127_i32 = arith.constant 127 : i32
    %6 = tpu.dynamic_rotate %0 by %c127_i32 dim 0 : vector<128x128xf32>, i32 -> vector<128x128xf32>
    %7 = vector.broadcast %2 : vector<128x1xf32> to vector<128x128xf32>
    %8 = arith.mulf %6, %7 : vector<128x128xf32>
    %9 = tpu.concatenate %5, %0, %8 in 1 : vector<128x128xf32>, vector<128x128xf32>, vector<128x128xf32> -> vector<128x384xf32>
    %10 = arith.truncf %9 : vector<128x384xf32> to vector<128x384xbf16>
    %c0_5 = arith.constant 0 : index
    %c0_6 = arith.constant 0 : index
    %11 = vector.load %arg2[%c0_5, %c0_6] : memref<384x128xbf16, #tpu.memory_space<vmem>>, vector<384x128xbf16>
    %cst = arith.constant dense<0.000000e+00> : vector<128x128xf32>
    %12 = tpu.matmul %10, %11, %cst {dimension_numbers = #tpu.dot_dimension_numbers<[1], [0], [0], [1], [0, 0, 1, 1], [], []>} : vector<128x384xbf16>, vector<384x128xbf16>, vector<128x128xf32> -> vector<128x128xf32>
    %c0_7 = arith.constant 0 : index
    %c0_8 = arith.constant 0 : index
    %13 = vector.load %arg3[%c0_7, %c0_8] : memref<1x128xf32, #tpu.memory_space<vmem>>, vector<1x128xf32>
    %14 = vector.broadcast %13 : vector<1x128xf32> to vector<128x128xf32>
    %15 = arith.addf %12, %14 : vector<128x128xf32>
    %cst_9 = arith.constant 0.000000e+00 : f32
    %16 = vector.broadcast %cst_9 : f32 to vector<128x128xf32>
    %17 = arith.maximumf %15, %16 : vector<128x128xf32>
    %c1_i32_10 = arith.constant 1 : i32
    %18 = tpu.dynamic_rotate %17 by %c1_i32_10 dim 0 : vector<128x128xf32>, i32 -> vector<128x128xf32>
    %19 = vector.broadcast %1 : vector<128x1xf32> to vector<128x128xf32>
    %20 = arith.mulf %18, %19 : vector<128x128xf32>
    %c127_i32_11 = arith.constant 127 : i32
    %21 = tpu.dynamic_rotate %17 by %c127_i32_11 dim 0 : vector<128x128xf32>, i32 -> vector<128x128xf32>
    %22 = vector.broadcast %2 : vector<128x1xf32> to vector<128x128xf32>
    %23 = arith.mulf %21, %22 : vector<128x128xf32>
    %24 = tpu.concatenate %20, %17, %23 in 1 : vector<128x128xf32>, vector<128x128xf32>, vector<128x128xf32> -> vector<128x384xf32>
    %25 = arith.truncf %24 : vector<128x384xf32> to vector<128x384xbf16>
    %c0_12 = arith.constant 0 : index
    %c0_13 = arith.constant 0 : index
    %26 = vector.load %arg4[%c0_12, %c0_13] : memref<384x128xbf16, #tpu.memory_space<vmem>>, vector<384x128xbf16>
    %cst_14 = arith.constant dense<0.000000e+00> : vector<128x128xf32>
    %27 = tpu.matmul %25, %26, %cst_14 {dimension_numbers = #tpu.dot_dimension_numbers<[1], [0], [0], [1], [0, 0, 1, 1], [], []>} : vector<128x384xbf16>, vector<384x128xbf16>, vector<128x128xf32> -> vector<128x128xf32>
    %c0_15 = arith.constant 0 : index
    %c0_16 = arith.constant 0 : index
    %28 = vector.load %arg5[%c0_15, %c0_16] : memref<1x128xf32, #tpu.memory_space<vmem>>, vector<1x128xf32>
    %29 = vector.broadcast %28 : vector<1x128xf32> to vector<128x128xf32>
    %30 = arith.addf %27, %29 : vector<128x128xf32>
    %31 = arith.addf %30, %0 : vector<128x128xf32>
    %cst_17 = arith.constant 0.000000e+00 : f32
    %32 = vector.broadcast %cst_17 : f32 to vector<128x128xf32>
    %33 = arith.maximumf %31, %32 : vector<128x128xf32>
    %c0_18 = arith.constant 0 : index
    %c0_19 = arith.constant 0 : index
    %34 = vector.load %arg8[%c0_18, %c0_19] : memref<128x128xf32, #tpu.memory_space<vmem>>, vector<128x128xf32>
    tpu.vector_store %arg8[%c0_18, %c0_19], %33 {strides = array<i32>} : memref<128x128xf32, #tpu.memory_space<vmem>>, vector<128x128xf32>,
    return
  }
  func.func @transform_0(%arg0: i32) -> (i32, i32) {
    %c0_i32 = arith.constant 0 : i32
    %c0_i32_0 = arith.constant 0 : i32
    return %arg0, %c0_i32 : i32, i32
  }
  func.func @transform_1(%arg0: i32) -> (i32, i32) {
    %c0_i32 = arith.constant 0 : i32
    %c0_i32_0 = arith.constant 0 : i32
    %c0_i32_1 = arith.constant 0 : i32
    return %c0_i32, %c0_i32_0 : i32, i32
  }
  func.func @transform_2(%arg0: i32) -> (i32, i32) {
    %c0_i32 = arith.constant 0 : i32
    %c0_i32_0 = arith.constant 0 : i32
    %c0_i32_1 = arith.constant 0 : i32
    return %c0_i32, %c0_i32_0 : i32, i32
  }
  func.func @transform_3(%arg0: i32) -> (i32, i32) {
    %c0_i32 = arith.constant 0 : i32
    %c0_i32_0 = arith.constant 0 : i32
    %c0_i32_1 = arith.constant 0 : i32
    return %c0_i32, %c0_i32_0 : i32, i32
  }
  func.func @transform_4(%arg0: i32) -> (i32, i32) {
    %c0_i32 = arith.constant 0 : i32
    %c0_i32_0 = arith.constant 0 : i32
    %c0_i32_1 = arith.constant 0 : i32
    return %c0_i32, %c0_i32_0 : i32, i32
  }
  func.func @transform_5(%arg0: i32) -> (i32, i32) {
    %c0_i32 = arith.constant 0 : i32
    %c0_i32_0 = arith.constant 0 : i32
    %c0_i32_1 = arith.constant 0 : i32
    return %c0_i32, %c0_i32_0 : i32, i32
  }
  func.func @transform_6(%arg0: i32) -> (i32, i32) {
    %c0_i32 = arith.constant 0 : i32
    %c0_i32_0 = arith.constant 0 : i32
    %c0_i32_1 = arith.constant 0 : i32
    return %c0_i32, %c0_i32_0 : i32, i32
  }
  func.func @transform_7(%arg0: i32) -> (i32, i32) {
    %c0_i32 = arith.constant 0 : i32
    %c0_i32_0 = arith.constant 0 : i32
    return %arg0, %c0_i32 : i32, i32
  }
}

</mosaic_0001>

<bundles_post_ra>
// kernel: basic_block_forward.1
= control target key start
LH: loop header
LB: loop body
LE: loop exit
PB: predicated region body
PF: predicated region fallthrough
CT: control target
= control target key end

     0   :  { %s1879_s24 = smov 0   ;;  %s2672_s0 = inlined_call_operand.vmem [shape: f32[256,128], index: 0, kind: input, shape index: {}]   ;;  %s2673_s1 = inlined_call_operand.vmem [shape: bf16[384,128], index: 1, kind: input, shape index: {}]   ;;  %s2674_s2 = inlined_call_operand.vmem [shape: f32[1,128], index: 2, kind: input, shape index: {}]   ;;  %s2675_s3 = inlined_call_operand.vmem [shape: bf16[384,128], index: 3, kind: input, shape index: {}]   ;;  %s2676_s4 = inlined_call_operand.vmem [shape: f32[1,128], index: 4, kind: input, shape index: {}]   ;;  %s2677_s5 = inlined_call_operand.vmem [shape: f32[128,1], index: 5, kind: input, shape index: {}]   ;;  %s2678_s6 = inlined_call_operand.vmem [shape: f32[128,1], index: 6, kind: input, shape index: {}]   ;;  %s2679_s7 = inlined_call_operand.vmem [shape: f32[256,128], index: 7, kind: output, shape index: {}]  }
   0x1 LB: > { %s1540_s25 = sadd.s32 4294967295, %s1836_s24   ;;  %p1544_p0 = scmp.ge.s32.totalorder %s1836_s24, 1  ;;  %s1836_s24 = sphi %s1879_s24, %s17_s24  }
   0x2   : > { %p238_p1 = scmp.lt.s32.totalorder %s1836_s24, 3 }
   0x4   : > { %p239_p2 = pnand %p1544_p0, %p238_p1 }
   0x6   : > { %242 = sbr.rel (%p239_p2) target bundleno = 731 (0x2db), region = 48 }
   0xb   : > { %v310_v0 = vld [vmem:[%s2677_s5 + $0x60] sm:$0xff]  ;;  %v308_v1 = vld [vmem:[%s2677_s5 + $0x50] sm:$0xff]  ;;  %v1838_v3 = vmov 0   ;;  %v311_v4 = vld [vmem:[%s2677_s5 + $0x68] sm:$0xff]  ;;  %s1545_s20 = sshll.u32 %s1540_s25, 4  ;;  %v346_v54 = vlaneseq }
   0xc   : > { %v306_v2 = vld [vmem:[%s2677_s5 + $0x40] sm:$0xff]  ;;  %1818 = vset.pattern.permute.xlu2 %v1838_v3  ;;  %1817 = vset.pattern.permute.xlu1 %v1838_v3  ;;  %v309_v5 = vld [vmem:[%s2677_s5 + $0x58] sm:$0xff]  ;;  %v307_v6 = vld [vmem:[%s2677_s5 + $0x48] sm:$0xff]  ;;  %p271_p3 = scmp.lt.s32.totalorder %s1545_s20, 31 }
   0xd   : > { %1816 = vset.pattern.permute.xlu0 %v1838_v3  ;;  %427 = vperm.xlu2 %1818, %v310_v0   ;;  %v314_v7 = vld [vmem:[%s2678_s6] sm:$0xff]  ;;  %v313_v8 = vld [vmem:[%s2677_s5 + $0x78] sm:$0xff]  ;;  %v312_v9 = vld [vmem:[%s2677_s5 + $0x70] sm:$0xff]  ;;  %v2070_v60 = vshrl.u32 %v346_v54, 7 }
   0xe   : > { %417 = vperm.xlu1 %1817, %v308_v1   ;;  %407 = vperm.xlu0 %1816, %v306_v2   ;;  %v317_v10 = vld [vmem:[%s2678_s6 + $0x18] sm:$0xff]  ;;  %v316_v11 = vld [vmem:[%s2678_s6 + $0x10] sm:$0xff]  ;;  %v315_v12 = vld [vmem:[%s2678_s6 + $0x8] sm:$0xff]  ;;  %s2715_s20 = smov (!%p271_p3, %s1545_s20), 31 }
   0xf   : > { %v320_v13 = vld [vmem:[%s2678_s6 + $0x30] sm:$0xff]  ;;  %v319_v14 = vld [vmem:[%s2678_s6 + $0x28] sm:$0xff]  ;;  %v318_v15 = vld [vmem:[%s2678_s6 + $0x20] sm:$0xff]  ;;  %s1546_s11 = sshll.u32 %s2715_s20, 3  ;;  %vm348_vm0 = vcmp.lt.s32.totalorder %v2070_v60, 1  ;;  %vm477_vm1 = vcmp.lt.s32.totalorder %v2070_v60, 7 }
  0x10   : > { %v323_v16 = vld [vmem:[%s2678_s6 + $0x48] sm:$0xff]  ;;  %v322_v17 = vld [vmem:[%s2678_s6 + $0x40] sm:$0xff]  ;;  %v321_v18 = vld [vmem:[%s2678_s6 + $0x38] sm:$0xff]  ;;  %s2038_s16 = scalar_lea.vmem %s2672_s0, %s1546_s11  ;;  %s2621_s12 = scalar_lea.vmem %s2679_s7, %s1546_s11 }
  0x11   : > { %v326_v19 = vld [vmem:[%s2678_s6 + $0x60] sm:$0xff]  ;;  %v325_v20 = vld [vmem:[%s2678_s6 + $0x58] sm:$0xff]  ;;  %v324_v21 = vld [vmem:[%s2678_s6 + $0x50] sm:$0xff] }
  0x12   : > { %v329_v22 = vld [vmem:[%s2678_s6 + $0x78] sm:$0xff]  ;;  %v328_v23 = vld [vmem:[%s2678_s6 + $0x70] sm:$0xff]  ;;  %v327_v24 = vld [vmem:[%s2678_s6 + $0x68] sm:$0xff] }
  0x13   : > { %v1750_v25 = vld [vmem:[%s2673_s1 + $0x38] sm:$0xff]  ;;  %v300_v27 = vld [vmem:[%s2677_s5 + $0x10] sm:$0xff]  ;;  %v299_v28 = vld [vmem:[%s2677_s5 + $0x8] sm:$0xff] }
  0x14   : > { %v1758_v26 = vld [vmem:[%s2673_s1 + $0x78] sm:$0xff]  ;;  %1791 = vmatpush.bf16.msra.mxu2 %v1750_v25  ;;  %v298_v29 = vld [vmem:[%s2677_s5] sm:$0xff]  ;;  %810 = vmatpush.bf16.msra.mxu0 %v1750_v25  ;;  %v1749_v30 = vld [vmem:[%s2673_s1 + $0x30] sm:$0xff] }
  0x15   : > { %432 = vperm.xlu2 %1818, %v311_v4   ;;  %1799 = vmatpush.bf16.msra.mxu3 %v1758_v26  ;;  %v1757_v31 = vld [vmem:[%s2673_s1 + $0x70] sm:$0xff]  ;;  %v303_v32 = vld [vmem:[%s2677_s5 + $0x28] sm:$0xff]  ;;  %v302_v33 = vld [vmem:[%s2677_s5 + $0x20] sm:$0xff] }
  0x16   : > { %422 = vperm.xlu1 %1817, %v309_v5   ;;  %412 = vperm.xlu0 %1816, %v307_v6   ;;  %v301_v34 = vld [vmem:[%s2677_s5 + $0x18] sm:$0xff]  ;;  %v1748_v35 = vld [vmem:[%s2673_s1 + $0x28] sm:$0xff]  ;;  %v1747_v37 = vld [vmem:[%s2673_s1 + $0x20] sm:$0xff] }
  0x17   : > { %859 = vmatpush.bf16.msra.mxu1 %v1758_v26  ;;  %v1756_v36 = vld [vmem:[%s2673_s1 + $0x68] sm:$0xff]  ;;  %v1755_v38 = vld [vmem:[%s2673_s1 + $0x60] sm:$0xff]  ;;  %v305_v39 = vld [vmem:[%s2677_s5 + $0x38] sm:$0xff] }
  0x18   : > { %1792 = vmatpush.bf16.msra.mxu2 %v1749_v30  ;;  %811 = vmatpush.bf16.msra.mxu0 %v1749_v30  ;;  %v304_v40 = vld [vmem:[%s2677_s5 + $0x30] sm:$0xff]  ;;  %v1746_v41 = vld [vmem:[%s2673_s1 + $0x18] sm:$0xff]  ;;  %v1744_v45 = vld [vmem:[%s2673_s1 + $0x8] sm:$0xff] }
  0x19   : > { %1800 = vmatpush.bf16.msra.mxu3 %v1757_v31  ;;  %v1754_v42 = vld [vmem:[%s2673_s1 + $0x58] sm:$0xff]  ;;  %v1745_v43 = vld [vmem:[%s2673_s1 + $0x10] sm:$0xff]  ;;  %v1752_v46 = vld [vmem:[%s2673_s1 + $0x48] sm:$0xff] }
  0x1a   : > { %v1753_v44 = vld [vmem:[%s2673_s1 + $0x50] sm:$0xff]  ;;  %v1743_v47 = vld [vmem:[%s2673_s1] sm:$0xff]  ;;  %v2044_v49 = vld [vmem:[%s2038_s16 + $0x48] sm:$0xff] }
  0x1b   : > { %860 = vmatpush.bf16.msra.mxu1 %v1757_v31  ;;  %v1751_v48 = vld [vmem:[%s2673_s1 + $0x40] sm:$0xff]  ;;  %v1766_v51 = vld [vmem:[%s2673_s1 + $0xb8] sm:$0xff]  ;;  %v1765_v53 = vld [vmem:[%s2673_s1 + $0xb0] sm:$0xff]  ;;  %v339_v1 = vrot.slane %v2044_v49, 7 }
  0x1c   : > { %1793 = vmatpush.bf16.msra.mxu2 %v1748_v35  ;;  %812 = vmatpush.bf16.msra.mxu0 %v1748_v35  ;;  %v2047_v50 = vld [vmem:[%s2038_s16 + $0x40] sm:$0xff]  ;;  %v2058_v55 = vld [vmem:[%s2038_s16 + $0x58] sm:$0xff]  ;;  %v2061_v56 = vld [vmem:[%s2038_s16 + $0x50] sm:$0xff] }
  0x1d   : > { %496 = vperm.xlu2 %1818, %v314_v7   ;;  %1801 = vmatpush.bf16.msra.mxu3 %v1756_v36  ;;  %v603_v52 = vpack.c.bf16 %v2044_v49, %v2047_v50  ;;  %v1764_v58 = vld [vmem:[%s2673_s1 + $0xa8] sm:$0xff]  ;;  %v606_v59 = vpack.c.bf16 %v2058_v55, %v2061_v56  ;;  %v2073_v61 = vld [vmem:[%s2038_s16 + $0x38] sm:$0xff]  ;;  %v1763_v0 = vld [vmem:[%s2673_s1 + $0xa0] sm:$0xff]  ;;  %v338_v3 = vrot.slane %v2047_v50, 7 }
  0x1e   : > { %442 = vperm.xlu1 %1817, %v313_v8   ;;  %437 = vperm.xlu0 %1816, %v312_v9   ;;  %v337_v2 = vrot.slane %v2073_v61, 7  ;;  %v2135_v30 = vld [vmem:[%s2038_s16 + $0x70] sm:$0xff]  ;;  %v2138_v31 = vld [vmem:[%s2038_s16 + $0x78] sm:$0xff] }
  0x1f   : > { %861 = vmatpush.bf16.msra.mxu1 %v1756_v36  ;;  %v355_v5 = vsel %vm348_vm0, %v338_v3, %v339_v1  ;;  %v345_v54 = vrot.slane %v2138_v31, 7 }
  0x20   : > { %1794 = vmatpush.bf16.msra.mxu2 %v1747_v37  ;;  %813 = vmatpush.bf16.msra.mxu0 %v1747_v37  ;;  %v356_v4 = vsel %vm348_vm0, %v337_v2, %v338_v3 }
  0x21   : > { %1802 = vmatpush.bf16.msra.mxu3 %v1755_v38 }
  0x23   : > { %862 = vmatpush.bf16.msra.mxu1 %v1755_v38 }
  0x24   : > { %1795 = vmatpush.bf16.msra.mxu2 %v1746_v41  ;;  %814 = vmatpush.bf16.msra.mxu0 %v1746_v41  ;;  %v2159_v41 = vld [vmem:[%s2038_s16 + $0x8] sm:$0xff] }
  0x25   : > { %511 = vperm.xlu2 %1818, %v317_v10   ;;  %1803 = vmatpush.bf16.msra.mxu3 %v1754_v42  ;;  %2694 = vst [vmem:[#allocation4_spill] sm:$0xff] %v2159_v41 }
  0x26   : > { %506 = vperm.xlu1 %1817, %v316_v11   ;;  %501 = vperm.xlu0 %1816, %v315_v12   ;;  %v2101_v12 = vld [vmem:[%s2038_s16 + $0x60] sm:$0xff] }
  0x27   : > { %863 = vmatpush.bf16.msra.mxu1 %v1754_v42 }
  0x28   : > { %1796 = vmatpush.bf16.msra.mxu2 %v1745_v43  ;;  %815 = vmatpush.bf16.msra.mxu0 %v1745_v43  ;;  %v1759_v43 = vld [vmem:[%s2673_s1 + $0x80] sm:$0xff] }
  0x29   : > { %1804 = vmatpush.bf16.msra.mxu3 %v1753_v44 }
  0x2b   : > { %864 = vmatpush.bf16.msra.mxu1 %v1753_v44 }
  0x2c   : > { %1797 = vmatpush.bf16.msra.mxu2 %v1744_v45  ;;  %816 = vmatpush.bf16.msra.mxu0 %v1744_v45 }
  0x2d   : > { %526 = vperm.xlu2 %1818, %v320_v13   ;;  %1805 = vmatpush.bf16.msra.mxu3 %v1752_v46  ;;  %v2104_v13 = vld [vmem:[%s2038_s16 + $0x68] sm:$0xff] }
  0x2e   : > { %521 = vperm.xlu1 %1817, %v319_v14   ;;  %516 = vperm.xlu0 %1816, %v318_v15   ;;  %v1762_v14 = vld [vmem:[%s2673_s1 + $0x98] sm:$0xff]  ;;  %v609_v15 = vpack.c.bf16 %v2104_v13, %v2101_v12  ;;  %v343_v37 = vrot.slane %v2104_v13, 7 }
  0x2f   : > { %865 = vmatpush.bf16.msra.mxu1 %v1752_v46 }
  0x30   : > { %1798 = vmatpush.bf16.msra.mxu2 %v1743_v47  ;;  %817 = vmatpush.bf16.msra.mxu0 %v1743_v47 }
  0x31   : > { %1806 = vmatpush.bf16.msra.mxu3 %v1751_v48 }
  0x33   : > { %866 = vmatpush.bf16.msra.mxu1 %v1751_v48 }
  0x34   : > { %908 = vmatpush.bf16.msrb.mxu2 %v1766_v51  ;;  %887 = vmatmul.bf16.vlgmr.msra.gmra.mxu3 %v603_v52 }
  0x35   : > { %541 = vperm.xlu2 %1818, %v323_v16   ;;  %v341_v16 = vrot.slane %v2058_v55, 7 }
  0x36   : > { %536 = vperm.xlu1 %1817, %v322_v17   ;;  %531 = vperm.xlu0 %1816, %v321_v18   ;;  %v340_v17 = vrot.slane %v2061_v56, 7 }
  0x38   : > { %909 = vmatpush.bf16.msrb.mxu2 %v1765_v53  ;;  %v344_v53 = vrot.slane %v2135_v30, 7 }
  0x3a   : > { %v350_v3 = vsel %vm348_vm0, %v343_v37, %v344_v53 }
  0x3c   : > { %910 = vmatpush.bf16.msrb.mxu2 %v1764_v58 }
  0x3d   : > { %556 = vperm.xlu2 %1818, %v326_v19  }
  0x3e   : > { %551 = vperm.xlu1 %1817, %v325_v20   ;;  %546 = vperm.xlu0 %1816, %v324_v21   ;;  %v1761_v21 = vld [vmem:[%s2673_s1 + $0x90] sm:$0xff] }
  0x40   : > { %911 = vmatpush.bf16.msrb.mxu2 %v1763_v0  ;;  %v2183_v0 = vld [vmem:[%s2038_s16 + $0x18] sm:$0xff] }
  0x41   : > { %2695 = vst [vmem:[#allocation5_spill] sm:$0xff] %v2183_v0 }
  0x44   : > { %892 = vmatmul.bf16.gmra.mxu3 %v606_v59  ;;  %912 = vmatpush.bf16.msrb.mxu2 %v1762_v14 }
  0x45   : > { %571 = vperm.xlu2 %1818, %v329_v22   ;;  %v354_v22 = vsel %vm348_vm0, %v339_v1, %v340_v17  ;;  %v349_v1 = vsel %vm348_vm0, %v344_v53, %v345_v54 }
  0x46   : > { %566 = vperm.xlu1 %1817, %v328_v23   ;;  %561 = vperm.xlu0 %1816, %v327_v24   ;;  %v353_v23 = vsel %vm348_vm0, %v340_v17, %v341_v16 }
  0x48   : > { %913 = vmatpush.bf16.msrb.mxu2 %v1761_v21  ;;  %v331_v21 = vrot.slane %v2159_v41, 7 }
  0x4d   : > { %377 = vperm.xlu2 %1818, %v300_v27  }
  0x4e   : > { %372 = vperm.xlu1 %1817, %v299_v28   ;;  %367 = vperm.xlu0 %1816, %v298_v29  }
  0x54   : > { %897 = vmatmul.bf16.gmra.mxu3 %v609_v15 }
  0x55   : > { %392 = vperm.xlu2 %1818, %v303_v32   ;;  %v1760_v32 = vld [vmem:[%s2673_s1 + $0x88] sm:$0xff] }
  0x56   : > { %387 = vperm.xlu1 %1817, %v302_v33   ;;  %382 = vperm.xlu0 %1816, %v301_v34   ;;  %v612_v33 = vpack.c.bf16 %v2138_v31, %v2135_v30  ;;  %v342_v34 = vrot.slane %v2101_v12, 7 }
  0x57   : > { %914 = vmatpush.bf16.msrb.mxu2 %v1760_v32 }
  0x58   : > { %v352_v38 = vsel %vm348_vm0, %v341_v16, %v342_v34 }
  0x5b   : > { %915 = vmatpush.bf16.msrb.mxu2 %v1759_v43  ;;  %v2223_v43 = vld [vmem:[%s2038_s16 + $0x20] sm:$0xff] }
  0x5c   : > { %2698 = vst [vmem:[#allocation8_spill] sm:$0xff] %v2223_v43 }
  0x5e   : > { %402 = vperm.xlu1 %1817, %v305_v39   ;;  %397 = vperm.xlu0 %1816, %v304_v40   ;;  %v351_v39 = vsel %vm348_vm0, %v342_v34, %v343_v37  ;;  %v2156_v40 = vld [vmem:[%s2038_s16] sm:$0xff] }
  0x5f   : > { %2693 = vst [vmem:[#allocation3_spill] sm:$0xff] %v2156_v40  ;;  %v591_v44 = vpack.c.bf16 %v2159_v41, %v2156_v40  ;;  %v330_v16 = vrot.slane %v2156_v40, 7 }
  0x61   : > { %867 = vmatmul.bf16.vlgmr.msra.gmra.mxu1 %v591_v44 }
  0x64   : > { %902 = vmatmul.bf16.gmra.mxu3 %v612_v33 }
  0x67   : > { %v2063_v57 = vpop.permute.xlu2 %427 }
  0x68   : > { %v457_v45 = vmul.f32 %v2063_v57, %v352_v38 }
  0x6f   : > { %v2092_v6 = vpop.permute.xlu2 %432 }
  0x70   : > { %v458_v46 = vmul.f32 %v2092_v6, %v351_v39 }
  0x72   : > { %v608_v51 = vpack.c.bf16 %v458_v46, %v457_v45  ;;  %v2230_v46 = vld [vmem:[%s2038_s16 + $0x28] sm:$0xff] }
  0x73   : > { %2700 = vst [vmem:[#allocation10_spill] sm:$0xff] %v2230_v46 }
  0x77   : > { %v2117_v20 = vpop.permute.xlu2 %496 }
  0x7f   : > { %v2132_v28 = vpop.permute.xlu2 %511 }
  0x80   : > { %v2075_v62 = vpop.permute.xlu1 %417  ;;  %v2077_v63 = vpop.permute.xlu0 %407 }
  0x81   : > { %v453_v9 = vmul.f32 %v2077_v63, %v356_v4  ;;  %v455_v24 = vmul.f32 %v2075_v62, %v354_v22  ;;  %v2190_v4 = vld [vmem:[%s2038_s16 + $0x10] sm:$0xff]  ;;  %v363_v22 = vsel %vm348_vm0, %v330_v16, %v331_v21 }
  0x82   : > { %2696 = vst [vmem:[#allocation6_spill] sm:$0xff] %v2190_v4 }
  0x87   : > { %v2161_v42 = vpop.permute.xlu2 %526 }
  0x88   : > { %v2094_v7 = vpop.permute.xlu1 %422  ;;  %v2096_v8 = vpop.permute.xlu0 %412 }
  0x89   : > { %v454_v10 = vmul.f32 %v2096_v8, %v355_v5  ;;  %v456_v25 = vmul.f32 %v2094_v7, %v353_v23  ;;  %v594_v5 = vpack.c.bf16 %v2183_v0, %v2190_v4  ;;  %v364_v23 = vsel %vm348_vm0, %v345_v54, %v330_v16 }
  0x8b   : > { %v602_v11 = vpack.c.bf16 %v454_v10, %v453_v9  ;;  %v605_v29 = vpack.c.bf16 %v456_v25, %v455_v24  ;;  %872 = vmatmul.bf16.gmra.mxu1 %v594_v5  ;;  %v461_v24 = vrot.slane %v2156_v40, 1  ;;  %v462_v25 = vrot.slane %v2159_v41, 1 }
  0x8d   : > { %838 = vmatmul.bf16.vlgmr.msra.gmra.mxu2 %v602_v11  ;;  %v492_v39 = vsel %vm477_vm1, %v461_v24, %v462_v25 }
  0x8e   : > { %v574_v53 = vmul.f32 %v2117_v20, %v492_v39  ;;  %v2253_v39 = vld [vmem:[%s2038_s16 + $0x30] sm:$0xff] }
  0x8f   : > { %v2174_v52 = vpop.permute.xlu2 %541  ;;  %2701 = vst [vmem:[#allocation11_spill] sm:$0xff] %v2253_v39 }
  0x90   : > { %v2113_v18 = vpop.permute.xlu1 %442  ;;  %v2115_v19 = vpop.permute.xlu0 %437 }
  0x91   : > { %2692 = vst [vmem:[#allocation2_spill] sm:$0xff] %v2113_v18  ;;  %v460_v9 = vmul.f32 %v2113_v18, %v349_v1  ;;  %v459_v10 = vmul.f32 %v2115_v19, %v350_v3  ;;  %v333_v1 = vrot.slane %v2183_v0, 7  ;;  %v332_v3 = vrot.slane %v2190_v4, 7 }
  0x93   : > { %v611_v17 = vpack.c.bf16 %v460_v9, %v459_v10  ;;  %v361_v10 = vsel %vm348_vm0, %v332_v3, %v333_v1 }
  0x97   : > { %v2200_v15 = vpop.permute.xlu2 %556 }
  0x98   : > { %v2128_v26 = vpop.permute.xlu1 %506  ;;  %v2130_v27 = vpop.permute.xlu0 %501 }
  0x9d   : > { %843 = vmatmul.bf16.gmra.mxu2 %v605_v29  ;;  %v463_v29 = vrot.slane %v2190_v4, 1 }
  0x9f   : > { %v491_v44 = vsel %vm477_vm1, %v462_v25, %v463_v29  ;;  %v2227_v45 = vpop.permute.xlu2 %571  ;;  %v465_v25 = vrot.slane %v2223_v43, 1 }
  0xa0   : > { %v2146_v35 = vpop.permute.xlu1 %521  ;;  %v2148_v36 = vpop.permute.xlu0 %516  ;;  %2699 = vst [vmem:[#allocation9_spill] sm:$0xff] %v2227_v45  ;;  %v575_v54 = vmul.f32 %v2130_v27, %v491_v44 }
  0xa2   : > { %v592_v5 = vpack.c.bf16 %v575_v54, %v574_v53  ;;  %v334_v54 = vrot.slane %v2223_v43, 7 }
  0xa7   : > { %v2242_v16 = vpop.permute.xlu2 %377 }
  0xa8   : > { %v2170_v47 = vpop.permute.xlu1 %536  ;;  %v2172_v48 = vpop.permute.xlu0 %531 }
  0xad   : > { %848 = vmatmul.bf16.gmra.mxu2 %v608_v51  ;;  %v597_v51 = vpack.c.bf16 %v2230_v46, %v2223_v43 }
  0xaf   : > { %877 = vmatmul.bf16.gmra.mxu1 %v597_v51 }
  0xb0   : > { %v2178_v58 = vpop.permute.xlu1 %551  ;;  %v2180_v59 = vpop.permute.xlu0 %546 }
  0xb8   : > { %v2196_v11 = vpop.permute.xlu1 %566  ;;  %v2198_v14 = vpop.permute.xlu0 %561 }
  0xb9   : > { %2697 = vst [vmem:[#allocation7_spill] sm:$0xff] %v2196_v11 }
  0xbd   : > { %853 = vmatmul.bf16.gmra.mxu2 %v611_v17  ;;  %v362_v17 = vsel %vm348_vm0, %v331_v21, %v332_v3  ;;  %v600_v21 = vpack.c.bf16 %v2073_v61, %v2253_v39  ;;  %v335_v3 = vrot.slane %v2230_v46, 7 }
  0xbf   : > { %882 = vmatmul.bf16.gmra.mxu1 %v600_v21 }
  0xc0   : > { %v2211_v32 = vpop.permute.xlu1 %372  ;;  %v2213_v33 = vpop.permute.xlu0 %367 }
  0xc1   : > { %v446_v34 = vmul.f32 %v2211_v32, %v363_v22  ;;  %v445_v37 = vmul.f32 %v2213_v33, %v364_v23  ;;  %v464_v23 = vrot.slane %v2183_v0, 1 }
  0xc3   : > { %v590_v38 = vpack.c.bf16 %v446_v34, %v445_v37  ;;  %v447_v34 = vmul.f32 %v2242_v16, %v362_v17  ;;  %v490_v44 = vsel %vm477_vm1, %v463_v29, %v464_v23  ;;  %v360_v17 = vsel %vm348_vm0, %v333_v1, %v334_v54  ;;  %v2267_v29 = vpop.permute.xlu2 %392 }
  0xc4   : > { %v576_v53 = vmul.f32 %v2128_v26, %v490_v44 }
  0xc5   : > { %818 = vmatmul.bf16.vlgmr.msra.gmra.mxu0 %v590_v38  ;;  %v489_v38 = vsel %vm477_vm1, %v464_v23, %v465_v25 }
  0xc6   : > { %v577_v51 = vmul.f32 %v2132_v28, %v489_v38 }
  0xc8   : > { %v2238_v9 = vpop.permute.xlu0 %382 }
  0xc9   : > { %v448_v22 = vmul.f32 %v2238_v9, %v361_v10  ;;  %v2263_v10 = vpop.permute.xlu1 %387 }
  0xca   : > { %v449_v23 = vmul.f32 %v2263_v10, %v360_v17 }
  0xcb   : > { %v593_v37 = vpack.c.bf16 %v448_v22, %v447_v34  ;;  %v359_v22 = vsel %vm348_vm0, %v334_v54, %v335_v3  ;;  %v467_v34 = vrot.slane %v2253_v39, 1  ;;  %v336_v54 = vrot.slane %v2253_v39, 7 }
  0xcc   : > { %v450_v38 = vmul.f32 %v2267_v29, %v359_v22 }
  0xcd   : > { %916 = vmatmul.bf16.vlgmr.msrb.gmra.mxu2 %v592_v5  ;;  %v595_v5 = vpack.c.bf16 %v577_v51, %v576_v53  ;;  %v357_v22 = vsel %vm348_vm0, %v336_v54, %v337_v2 }
  0xce   : > { %v596_v44 = vpack.c.bf16 %v450_v38, %v449_v23 }
  0xd0   : > { %v2288_v23 = vpop.permute.xlu0 %397 }
  0xd1   : > { %v2282_v17 = vpop.permute.xlu1 %402 }
  0xd5   : > { %823 = vmatmul.bf16.gmra.mxu0 %v593_v37  ;;  %v466_v37 = vrot.slane %v2230_v46, 1 }
  0xd7   : > { %v487_v21 = vsel %vm477_vm1, %v466_v37, %v467_v34  ;;  %v488_v1 = vsel %vm477_vm1, %v465_v25, %v466_v37  ;;  %v358_v25 = vsel %vm348_vm0, %v335_v3, %v336_v54  ;;  %v452_v37 = vmul.f32 %v2282_v17, %v357_v22 }
  0xd8   : > { %v579_v51 = vmul.f32 %v2146_v35, %v487_v21  ;;  %v578_v53 = vmul.f32 %v2148_v36, %v488_v1  ;;  %v451_v38 = vmul.f32 %v2288_v23, %v358_v25  ;;  %v468_v21 = vrot.slane %v2073_v61, 1 }
  0xda   : > { %v599_v1 = vpack.c.bf16 %v452_v37, %v451_v38  ;;  %v486_v2 = vsel %vm477_vm1, %v467_v34, %v468_v21  ;;  %v472_v38 = vrot.slane %v2058_v55, 1  ;;  %v1782_v55 = vld [vmem:[%s2675_s3 + $0x78] sm:$0xff] }
  0xdb   : > { %v580_v3 = vmul.f32 %v2161_v42, %v486_v2  ;;  %1338 = vmatpush.bf16.msrb.mxu0 %v1782_v55 }
  0xdd   : > { %921 = vmatmul.bf16.gmra.mxu2 %v595_v5  ;;  %v598_v5 = vpack.c.bf16 %v579_v51, %v578_v53 }
  0xe5   : > { %828 = vmatmul.bf16.gmra.mxu0 %v596_v44  ;;  %v469_v44 = vrot.slane %v2047_v50, 1  ;;  %v471_v50 = vrot.slane %v2061_v56, 1 }
  0xe7   : > { %v485_v51 = vsel %vm477_vm1, %v468_v21, %v469_v44 }
  0xe8   : > { %v581_v53 = vmul.f32 %v2172_v48, %v485_v51 }
  0xea   : > { %v601_v54 = vpack.c.bf16 %v581_v53, %v580_v3 }
  0xed   : > { %926 = vmatmul.bf16.gmra.mxu2 %v598_v5  ;;  %v470_v5 = vrot.slane %v2044_v49, 1  ;;  %v473_v49 = vrot.slane %v2101_v12, 1  ;;  %v475_v12 = vrot.slane %v2135_v30, 1  ;;  %v1780_v30 = vld [vmem:[%s2675_s3 + $0x68] sm:$0xff] }
  0xef   : > { %v484_v61 = vsel %vm477_vm1, %v469_v44, %v470_v5  ;;  %v483_v22 = vsel %vm477_vm1, %v470_v5, %v471_v50  ;;  %v481_v56 = vsel %vm477_vm1, %v472_v38, %v473_v49  ;;  %v482_v44 = vsel %vm477_vm1, %v471_v50, %v472_v38  ;;  %v1781_v5 = vld [vmem:[%s2675_s3 + $0x70] sm:$0xff]  ;;  %v1790_v38 = vld [vmem:[%s2675_s3 + $0xb8] sm:$0xff] }
  0xf0   : > { %v582_v25 = vmul.f32 %v2170_v47, %v484_v61  ;;  %v583_v34 = vmul.f32 %v2174_v52, %v483_v22  ;;  %v584_v51 = vmul.f32 %v2180_v59, %v482_v44  ;;  %1339 = vmatpush.bf16.msrb.mxu0 %v1781_v5  ;;  %1387 = vmatpush.bf16.msrb.mxu1 %v1790_v38 }
  0xf2   : > { %v604_v37 = vpack.c.bf16 %v583_v34, %v582_v25  ;;  %v1779_v34 = vld [vmem:[%s2675_s3 + $0x60] sm:$0xff] }
  0xf4   : > { %1340 = vmatpush.bf16.msrb.mxu0 %v1780_v30 }
  0xf5   : > { %833 = vmatmul.bf16.gmra.mxu0 %v599_v1  ;;  %v585_v1 = vmul.f32 %v2178_v58, %v481_v56  ;;  %v1789_v56 = vld [vmem:[%s2675_s3 + $0xb0] sm:$0xff] }
  0xf6   : > { %1388 = vmatpush.bf16.msrb.mxu1 %v1789_v56  ;;  %v1783_v56 = vld [vmem:[%s2675_s3 + $0x80] sm:$0xff] }
  0xf7   : > { %v607_v53 = vpack.c.bf16 %v585_v1, %v584_v51  ;;  %v476_v1 = vrot.slane %v2138_v31, 1  ;;  %v1777_v51 = vld [vmem:[%s2675_s3 + $0x50] sm:$0xff]  ;;  %v1776_v31 = vld [vmem:[%s2675_s3 + $0x48] sm:$0xff] }
  0xf8   : > { %1341 = vmatpush.bf16.msrb.mxu0 %v1779_v34  ;;  %v1785_v34 = vld [vmem:[%s2675_s3 + $0x90] sm:$0xff] }
  0xf9   : > { %v478_v55 = vsel %vm477_vm1, %v475_v12, %v476_v1 }
  0xfa   : > { %v588_v5 = vmul.f32 %v2196_v11, %v478_v55  ;;  %v2402_v55 = vld [vmem:[%s2674_s2] ss:$0 sm:$0xff] }
  0xfd   : > { %931 = vmatmul.bf16.gmra.mxu2 %v601_v54  ;;  %v474_v54 = vrot.slane %v2104_v13, 1 }
  0xff   : > { %v479_v50 = vsel %vm477_vm1, %v474_v54, %v475_v12  ;;  %v480_v61 = vsel %vm477_vm1, %v473_v49, %v474_v54  ;;  %v1778_v49 = vld [vmem:[%s2675_s3 + $0x58] sm:$0xff]  ;;  %v493_v54 = vsel %vm477_vm1, %v476_v1, %v461_v24  ;;  %v1775_v24 = vld [vmem:[%s2675_s3 + $0x40] sm:$0xff] }
 0x100   : > { %v587_v22 = vmul.f32 %v2198_v14, %v479_v50  ;;  %v586_v13 = vmul.f32 %v2200_v15, %v480_v61  ;;  %1342 = vmatpush.bf16.msrb.mxu0 %v1778_v49  ;;  %v1787_v50 = vld [vmem:[%s2675_s3 + $0xa0] sm:$0xff]  ;;  %v589_v12 = vmul.f32 %v2227_v45, %v493_v54  ;;  %v1784_v49 = vld [vmem:[%s2675_s3 + $0x88] sm:$0xff] }
 0x102   : > { %v613_v30 = vpack.c.bf16 %v589_v12, %v588_v5 }
 0x104   : > { %1343 = vmatpush.bf16.msrb.mxu0 %v1777_v51 }
 0x108   : > { %1344 = vmatpush.bf16.msrb.mxu0 %v1776_v31 }
 0x10c   : > { %1345 = vmatpush.bf16.msrb.mxu0 %v1775_v24 }
 0x10d   : > { %936 = vmatmul.bf16.gmra.mxu2 %v604_v37  ;;  %v610_v37 = vpack.c.bf16 %v587_v22, %v586_v13  ;;  %v1786_v22 = vld [vmem:[%s2675_s3 + $0x98] sm:$0xff]  ;;  %v868_v13 = vpop.f32.mrf.mxu1 }
 0x110   : > { %v2311_v21 = vpop.f32.mrf.mxu2 }
 0x115   : > { %v870_v51 = vpop.f32.mrf.mxu1 }
 0x118   : > { %v2320_v2 = vpop.f32.mrf.mxu2 }
 0x11d   : > { %941 = vmatmul.bf16.gmra.mxu2 %v607_v53  ;;  %v1788_v53 = vld [vmem:[%s2675_s3 + $0xa8] sm:$0xff] }
 0x11e   : > { %1389 = vmatpush.bf16.msrb.mxu1 %v1788_v53 }
 0x120   : > { %v2326_v3 = vpop.f32.mrf.mxu2 }
 0x122   : > { %1390 = vmatpush.bf16.msrb.mxu1 %v1787_v50  ;;  %v873_v50 = vpop.f32.mrf.mxu1 }
 0x126   : > { %1391 = vmatpush.bf16.msrb.mxu1 %v1786_v22 }
 0x128   : > { %v2340_v25 = vpop.f32.mrf.mxu2 }
 0x12a   : > { %1392 = vmatpush.bf16.msrb.mxu1 %v1785_v34  ;;  %v875_v0 = vpop.f32.mrf.mxu1 }
 0x12d   : > { %946 = vmatmul.bf16.gmra.mxu2 %v610_v37 }
 0x12e   : > { %1393 = vmatpush.bf16.msrb.mxu1 %v1784_v49 }
 0x130   : > { %v2355_v44 = vpop.f32.mrf.mxu2 }
 0x132   : > { %1394 = vmatpush.bf16.msrb.mxu1 %v1783_v56 }
 0x138   : > { %v2377_v61 = vpop.f32.mrf.mxu2 }
 0x13d   : > { %951 = vmatmul.bf16.gmra.mxu2 %v613_v30 }
 0x140   : > { %v2389_v37 = vpop.f32.mrf.mxu2 }
 0x142   : > { %v819_v38 = vpop.f32.mrf.mxu0 }
 0x143   : > { %v820_v54 = vadd.f32 %v2402_v55, %v819_v38 }
 0x145   : > { %v869_v12 = vadd.f32 %v868_v13, %v820_v54 }
 0x148   : > { %v2397_v1 = vpop.f32.mrf.mxu2 }
 0x14a   : > { %v821_v53 = vpop.f32.mrf.mxu0 }
 0x14b   : > { %v822_v24 = vadd.f32 %v2402_v55, %v821_v53 }
 0x14d   : > { %v871_v22 = vadd.f32 %v870_v51, %v822_v24 }
 0x150   : > { %v917_v31 = vpop.f32.mrf.mxu2 }
 0x151   : > { %v918_v30 = vadd.f32 %v917_v31, %v869_v12 }
 0x152   : > { %v824_v5 = vpop.f32.mrf.mxu0 }
 0x153   : > { %v2406_v49 = vmax.f32 %v918_v30, 0.0  ;;  %v825_v46 = vadd.f32 %v2402_v55, %v824_v5 }
 0x155   : > { %v2687_v4 = vrot.slane %v2406_v49, 7  ;;  %v874_v40 = vadd.f32 %v873_v50, %v825_v46  ;;  %v2690_v5 = vrot.slane %v2406_v49, 1  ;;  %v878_v46 = vpop.f32.mrf.mxu1 }
 0x158   : > { %v919_v34 = vpop.f32.mrf.mxu2 }
 0x159   : > { %v920_v56 = vadd.f32 %v919_v34, %v871_v22 }
 0x15a   : > { %v826_v39 = vpop.f32.mrf.mxu0 }
 0x15b   : > { %v958_v43 = vmax.f32 %v920_v56, 0.0  ;;  %v827_v12 = vadd.f32 %v2402_v55, %v826_v39 }
 0x15d   : > { %v974_v38 = vrot.slane %v958_v43, 7  ;;  %v1070_v41 = vpack.c.bf16 %v958_v43, %v2406_v49  ;;  %v1022_v53 = vrot.slane %v958_v43, 1  ;;  %v876_v50 = vadd.f32 %v875_v0, %v827_v12 }
 0x15f   : > { %1346 = vmatmul.bf16.vlgmr.msrb.gmra.mxu0 %v1070_v41  ;;  %v2415_v13 = vsel %vm348_vm0, %v2687_v4, %v974_v38  ;;  %v1051_v41 = vsel %vm477_vm1, %v2690_v5, %v1022_v53 }
 0x160   : > { %v922_v51 = vpop.f32.mrf.mxu2  ;;  %v1053_v56 = vmul.f32 %v1051_v41, %v2117_v20 }
 0x161   : > { %v923_v54 = vadd.f32 %v922_v51, %v874_v40 }
 0x162   : > { %v829_v31 = vpop.f32.mrf.mxu0 }
 0x163   : > { %v959_v24 = vmax.f32 %v923_v54, 0.0  ;;  %v830_v4 = vadd.f32 %v2402_v55, %v829_v31 }
 0x165   : > { %v975_v30 = vrot.slane %v959_v24, 7  ;;  %v1023_v22 = vrot.slane %v959_v24, 1  ;;  %v879_v12 = vadd.f32 %v878_v46, %v830_v4 }
 0x167   : > { %v1050_v34 = vsel %vm477_vm1, %v1022_v53, %v1023_v22  ;;  %v1002_v40 = vsel %vm348_vm0, %v974_v38, %v975_v30  ;;  %v880_v38 = vpop.f32.mrf.mxu1 }
 0x168   : > { %v924_v43 = vpop.f32.mrf.mxu2  ;;  %v1054_v39 = vmul.f32 %v1050_v34, %v2130_v27  ;;  %v2433_v20 = vmul.f32 %v1002_v40, %v2242_v16  ;;  %v1774_v16 = vld [vmem:[%s2675_s3 + $0x38] sm:$0xff] }
 0x169   : > { %v925_v51 = vadd.f32 %v924_v43, %v876_v50  ;;  %1289 = vmatpush.bf16.msrb.mxu3 %v1774_v16 }
 0x16a   : > { %v1071_v54 = vpack.c.bf16 %v1054_v39, %v1053_v56  ;;  %v831_v45 = vpop.f32.mrf.mxu0 }
 0x16b   : > { %v960_v18 = vmax.f32 %v925_v51, 0.0 }
 0x16c   : > { %1395 = vmatmul.bf16.vlgmr.msrb.gmra.mxu1 %v1071_v54 }
 0x16d   : > { %v976_v5 = vrot.slane %v960_v18, 7  ;;  %v1073_v0 = vpack.c.bf16 %v960_v18, %v959_v24  ;;  %v1024_v41 = vrot.slane %v960_v18, 1  ;;  %v832_v24 = vadd.f32 %v2402_v55, %v831_v45 }
 0x16f   : > { %1351 = vmatmul.bf16.gmra.mxu0 %v1073_v0  ;;  %v1001_v53 = vsel %vm348_vm0, %v975_v30, %v976_v5  ;;  %v1049_v30 = vsel %vm477_vm1, %v1023_v22, %v1024_v41  ;;  %v883_v22 = vpop.f32.mrf.mxu1 }
 0x170   : > { %v927_v11 = vpop.f32.mrf.mxu2  ;;  %v2436_v27 = vmul.f32 %v1001_v53, %v2238_v9  ;;  %v881_v9 = vadd.f32 %v880_v38, %v832_v24  ;;  %v1055_v43 = vmul.f32 %v1049_v30, %v2128_v26  ;;  %v1773_v38 = vld [vmem:[%s2675_s3 + $0x30] sm:$0xff] }
 0x171   : > { %v928_v31 = vadd.f32 %v927_v11, %v879_v12  ;;  %1290 = vmatpush.bf16.msrb.mxu3 %v1773_v38  ;;  %v840_v38 = vadd.f32 %v2402_v55, %v2311_v21 }
 0x172   : > { %v1072_v50 = vpack.c.bf16 %v2436_v27, %v2433_v20  ;;  %v834_v40 = vpop.f32.mrf.mxu0 }
 0x173   : > { %v961_v4 = vmax.f32 %v928_v31, 0.0  ;;  %v835_v54 = vadd.f32 %v2402_v55, %v834_v40 }
 0x175   : > { %v977_v46 = vrot.slane %v961_v4, 7  ;;  %v1025_v34 = vrot.slane %v961_v4, 1 }
 0x177   : > { %v1048_v18 = vsel %vm477_vm1, %v1024_v41, %v1025_v34  ;;  %v1000_v11 = vsel %vm348_vm0, %v976_v5, %v977_v46  ;;  %v888_v41 = vpop.f32.mrf.mxu3  ;;  %v884_v5 = vadd.f32 %v883_v22, %v835_v54 }
 0x178   : > { %v929_v45 = vpop.f32.mrf.mxu2  ;;  %v1056_v56 = vmul.f32 %v1048_v18, %v2132_v28  ;;  %v2459_v24 = vmul.f32 %v1000_v11, %v2263_v10  ;;  %v1772_v10 = vld [vmem:[%s2675_s3 + $0x28] sm:$0xff] }
 0x179   : > { %v930_v39 = vadd.f32 %v929_v45, %v881_v9  ;;  %v885_v45 = vpop.f32.mrf.mxu1  ;;  %1291 = vmatpush.bf16.msrb.mxu3 %v1772_v10 }
 0x17a   : > { %v1074_v51 = vpack.c.bf16 %v1056_v56, %v1055_v43  ;;  %v836_v28 = vpop.f32.mrf.mxu0 }
 0x17b   : > { %v962_v0 = vmax.f32 %v930_v39, 0.0  ;;  %v837_v9 = vadd.f32 %v2402_v55, %v836_v28 }
 0x17c   : > { %1400 = vmatmul.bf16.gmra.mxu1 %v1074_v51 }
 0x17d   : > { %v978_v12 = vrot.slane %v962_v0, 7  ;;  %v1076_v53 = vpack.c.bf16 %v962_v0, %v961_v4  ;;  %v1026_v4 = vrot.slane %v962_v0, 1 }
 0x17f   : > { %1356 = vmatmul.bf16.gmra.mxu0 %v1076_v53  ;;  %v999_v26 = vsel %vm348_vm0, %v977_v46, %v978_v12  ;;  %v1047_v46 = vsel %vm477_vm1, %v1025_v34, %v1026_v4  ;;  %v890_v22 = vpop.f32.mrf.mxu3 }
 0x180   : > { %v932_v31 = vpop.f32.mrf.mxu2  ;;  %v2462_v30 = vmul.f32 %v999_v26, %v2267_v29  ;;  %v886_v29 = vadd.f32 %v885_v45, %v837_v9  ;;  %v1057_v54 = vmul.f32 %v1047_v46, %v2148_v36 }
 0x181   : > { %v933_v16 = vadd.f32 %v932_v31, %v884_v5  ;;  %v1771_v31 = vld [vmem:[%s2675_s3 + $0x20] sm:$0xff] }
 0x182   : > { %v1075_v40 = vpack.c.bf16 %v2462_v30, %v2459_v24  ;;  %1292 = vmatpush.bf16.msrb.mxu3 %v1771_v31  ;;  %v2612_v24 = vld [vmem:[%s2676_s4] ss:$0 sm:$0xff] }
 0x183   : > { %v963_v18 = vmax.f32 %v933_v16, 0.0 }
 0x185   : > { %v979_v43 = vrot.slane %v963_v18, 7  ;;  %v1027_v56 = vrot.slane %v963_v18, 1 }
 0x187   : > { %v1046_v11 = vsel %vm477_vm1, %v1026_v4, %v1027_v56  ;;  %v998_v39 = vsel %vm348_vm0, %v978_v12, %v979_v43  ;;  %v889_v12 = vadd.f32 %v888_v41, %v840_v38  ;;  %v842_v41 = vadd.f32 %v2402_v55, %v2320_v2 }
 0x188   : > { %v934_v51 = vpop.f32.mrf.mxu2  ;;  %v1058_v0 = vmul.f32 %v1046_v11, %v2146_v35  ;;  %v2486_v4 = vmul.f32 %v998_v39, %v2288_v23 }
 0x189   : > { %v935_v53 = vadd.f32 %v934_v51, %v886_v29  ;;  %v891_v23 = vadd.f32 %v890_v22, %v842_v41 }
 0x18a   : > { %v1077_v34 = vpack.c.bf16 %v1058_v0, %v1057_v54 }
 0x18b   : > { %v964_v5 = vmax.f32 %v935_v53, 0.0 }
 0x18c   : > { %1405 = vmatmul.bf16.gmra.mxu1 %v1077_v34 }
 0x18d   : > { %v980_v26 = vrot.slane %v964_v5, 7  ;;  %v1079_v28 = vpack.c.bf16 %v964_v5, %v963_v18  ;;  %v1028_v16 = vrot.slane %v964_v5, 1  ;;  %v893_v18 = vpop.f32.mrf.mxu3 }
 0x18f   : > { %1361 = vmatmul.bf16.gmra.mxu0 %v1079_v28  ;;  %v997_v36 = vsel %vm348_vm0, %v979_v43, %v980_v26  ;;  %v1045_v43 = vsel %vm477_vm1, %v1027_v56, %v1028_v16  ;;  %v845_v56 = vadd.f32 %v2402_v55, %v2326_v3 }
 0x190   : > { %v937_v35 = vpop.f32.mrf.mxu2  ;;  %v2489_v21 = vmul.f32 %v997_v36, %v2282_v17  ;;  %v1770_v17 = vld [vmem:[%s2675_s3 + $0x18] sm:$0xff]  ;;  %v1059_v2 = vmul.f32 %v1045_v43, %v2161_v42 }
 0x191   : > { %v938_v9 = vadd.f32 %v937_v35, %v889_v12  ;;  %1293 = vmatpush.bf16.msrb.mxu3 %v1770_v17  ;;  %v894_v31 = vadd.f32 %v893_v18, %v845_v56  ;;  %v1767_v56 = vld [vmem:[%s2675_s3] sm:$0xff] }
 0x192   : > { %v1078_v45 = vpack.c.bf16 %v2489_v21, %v2486_v4 }
 0x193   : > { %v965_v46 = vmax.f32 %v938_v9, 0.0  ;;  %v847_v9 = vadd.f32 %v2402_v55, %v2340_v25 }
 0x195   : > { %v981_v10 = vrot.slane %v965_v46, 7  ;;  %v1029_v29 = vrot.slane %v965_v46, 1  ;;  %v895_v38 = vpop.f32.mrf.mxu3 }
 0x197   : > { %v1044_v11 = vsel %vm477_vm1, %v1028_v16, %v1029_v29  ;;  %v996_v39 = vsel %vm348_vm0, %v980_v26, %v981_v10  ;;  %v1769_v26 = vld [vmem:[%s2675_s3 + $0x10] sm:$0xff] }
 0x198   : > { %v939_v51 = vpop.f32.mrf.mxu2  ;;  %v1060_v54 = vmul.f32 %v1044_v11, %v2172_v48  ;;  %1294 = vmatpush.bf16.msrb.mxu3 %v1769_v26  ;;  %v2516_v12 = vmul.f32 %v996_v39, %v2077_v63  ;;  %v896_v63 = vadd.f32 %v895_v38, %v847_v9 }
 0x199   : > { %v940_v0 = vadd.f32 %v939_v51, %v891_v23  ;;  %v850_v51 = vadd.f32 %v2402_v55, %v2355_v44 }
 0x19a   : > { %v1080_v53 = vpack.c.bf16 %v1060_v54, %v1059_v2 }
 0x19b   : > { %v966_v34 = vmax.f32 %v940_v0, 0.0 }
 0x19c   : > { %1410 = vmatmul.bf16.gmra.mxu1 %v1080_v53 }
 0x19d   : > { %v982_v22 = vrot.slane %v966_v34, 7  ;;  %v1030_v5 = vrot.slane %v966_v34, 1  ;;  %v1082_v28 = vpack.c.bf16 %v966_v34, %v965_v46 }
 0x19f   : > { %1366 = vmatmul.bf16.gmra.mxu0 %v1082_v28  ;;  %v1043_v42 = vsel %vm477_vm1, %v1029_v29, %v1030_v5  ;;  %v995_v48 = vsel %vm348_vm0, %v981_v10, %v982_v22  ;;  %v1768_v10 = vld [vmem:[%s2675_s3 + $0x8] sm:$0xff]  ;;  %v898_v29 = vpop.f32.mrf.mxu3 }
 0x1a0   : > { %v942_v3 = vpop.f32.mrf.mxu2  ;;  %v2519_v36 = vmul.f32 %v995_v48, %v2096_v8  ;;  %1295 = vmatpush.bf16.msrb.mxu3 %v1768_v10  ;;  %v1061_v23 = vmul.f32 %v1043_v42, %v2170_v47  ;;  %v899_v34 = vadd.f32 %v898_v29, %v850_v51 }
 0x1a1   : > { %v943_v35 = vadd.f32 %v942_v3, %v894_v31  ;;  %v852_v31 = vadd.f32 %v2402_v55, %v2377_v61  ;;  %v855_v61 = vadd.f32 %v2402_v55, %v2389_v37 }
 0x1a2   : > { %v1081_v16 = vpack.c.bf16 %v2519_v36, %v2516_v12  ;;  %v2707_v36 = vld [vmem:[#allocation3_spill] sm:$0xff] }
 0x1a3   : > { %v967_v18 = vmax.f32 %v943_v35, 0.0 }
 0x1a4   : > { %1296 = vmatpush.bf16.msrb.mxu3 %v1767_v56 }
 0x1a5   : > { %v983_v41 = vrot.slane %v967_v18, 7  ;;  %v1031_v46 = vrot.slane %v967_v18, 1 }
 0x1a7   : > { %v1042_v8 = vsel %vm477_vm1, %v1030_v5, %v1031_v46  ;;  %v994_v43 = vsel %vm348_vm0, %v982_v22, %v983_v41  ;;  %v900_v38 = vpop.f32.mrf.mxu3 }
 0x1a8   : > { %v944_v17 = vpop.f32.mrf.mxu2  ;;  %v1062_v25 = vmul.f32 %v1042_v8, %v2174_v52  ;;  %v2544_v22 = vmul.f32 %v994_v43, %v2075_v62  ;;  %v901_v35 = vadd.f32 %v900_v38, %v852_v31 }
 0x1a9   : > { %v945_v11 = vadd.f32 %v944_v17, %v896_v63 }
 0x1aa   : > { %v1083_v39 = vpack.c.bf16 %v1062_v25, %v1061_v23 }
 0x1ab   : > { %v968_v2 = vmax.f32 %v945_v11, 0.0 }
 0x1ac   : > { %1415 = vmatmul.bf16.gmra.mxu1 %v1083_v39 }
 0x1ad   : > { %v984_v54 = vrot.slane %v968_v2, 7  ;;  %v1032_v0 = vrot.slane %v968_v2, 1  ;;  %v1085_v53 = vpack.c.bf16 %v968_v2, %v967_v18  ;;  %v857_v2 = vadd.f32 %v2402_v55, %v2397_v1 }
 0x1af   : > { %1371 = vmatmul.bf16.gmra.mxu0 %v1085_v53  ;;  %v1041_v47 = vsel %vm477_vm1, %v1031_v46, %v1032_v0  ;;  %v993_v52 = vsel %vm348_vm0, %v983_v41, %v984_v54  ;;  %v903_v10 = vpop.f32.mrf.mxu3 }
 0x1b0   : > { %v947_v44 = vpop.f32.mrf.mxu2  ;;  %v2547_v5 = vmul.f32 %v993_v52, %v2094_v7  ;;  %v1063_v7 = vmul.f32 %v1041_v47, %v2180_v59  ;;  %v904_v23 = vadd.f32 %v903_v10, %v855_v61 }
 0x1b1   : > { %v948_v28 = vadd.f32 %v947_v44, %v899_v34 }
 0x1b2   : > { %v1084_v26 = vpack.c.bf16 %v2547_v5, %v2544_v22 }
 0x1b3   : > { %v969_v42 = vmax.f32 %v948_v28, 0.0 }
 0x1b5   : > { %v985_v48 = vrot.slane %v969_v42, 7  ;;  %v1033_v3 = vrot.slane %v969_v42, 1 }
 0x1b7   : > { %v1040_v9 = vsel %vm477_vm1, %v1032_v0, %v1033_v3  ;;  %v992_v62 = vsel %vm348_vm0, %v984_v54, %v985_v48  ;;  %v905_v0 = vpop.f32.mrf.mxu3 }
 0x1b8   : > { %v949_v18 = vpop.f32.mrf.mxu2  ;;  %v1064_v41 = vmul.f32 %v1040_v9, %v2178_v58  ;;  %v1017_v11 = vmul.f32 %v992_v62, %v2063_v57  ;;  %v906_v34 = vadd.f32 %v905_v0, %v857_v2  ;;  %v2703_v9 = vrot.slane %v2406_v49, 1 }
 0x1b9   : > { %v950_v46 = vadd.f32 %v949_v18, %v901_v35  ;;  %v2702_v35 = vrot.slane %v2406_v49, 7 }
 0x1ba   : > { %v1086_v29 = vpack.c.bf16 %v1064_v41, %v1063_v7  ;;  %v2705_v7 = vld [vmem:[#allocation9_spill] sm:$0xff] }
 0x1bb   : > { %v970_v63 = vmax.f32 %v950_v46, 0.0  ;;  %v2706_v46 = vld [vmem:[#allocation2_spill] sm:$0xff] }
 0x1bc   : > { %1420 = vmatmul.bf16.gmra.mxu1 %v1086_v29 }
 0x1bd   : > { %v986_v8 = vrot.slane %v970_v63, 7  ;;  %v1034_v43 = vrot.slane %v970_v63, 1  ;;  %v1088_v17 = vpack.c.bf16 %v970_v63, %v969_v42 }
 0x1bf   : > { %1376 = vmatmul.bf16.gmra.mxu0 %v1088_v17  ;;  %v1039_v25 = vsel %vm477_vm1, %v1033_v3, %v1034_v43  ;;  %v991_v59 = vsel %vm348_vm0, %v985_v48, %v986_v8  ;;  %v1006_v48 = vmul.f32 %v2415_v13, %v2211_v32 }
 0x1c0   : > { %v952_v58 = vpop.f32.mrf.mxu2  ;;  %v1018_v39 = vmul.f32 %v991_v59, %v2092_v6  ;;  %v1065_v57 = vmul.f32 %v1039_v25, %v2200_v15  ;;  %v2708_v25 = vld [vmem:[#allocation4_spill] sm:$0xff] }
 0x1c1   : > { %v953_v51 = vadd.f32 %v952_v58, %v904_v23 }
 0x1c2   : > { %v1087_v37 = vpack.c.bf16 %v1018_v39, %v1017_v11 }
 0x1c3   : > { %v971_v54 = vmax.f32 %v953_v51, 0.0 }
 0x1c5   : > { %v987_v53 = vrot.slane %v971_v54, 7  ;;  %v1035_v56 = vrot.slane %v971_v54, 1 }
 0x1c7   : > { %v1038_v47 = vsel %vm477_vm1, %v1034_v43, %v1035_v56  ;;  %v990_v52 = vsel %vm348_vm0, %v986_v8, %v987_v53 }
 0x1c8   : > { %v954_v38 = vpop.f32.mrf.mxu2  ;;  %v1066_v6 = vmul.f32 %v1038_v47, %v2198_v14  ;;  %v1019_v3 = vmul.f32 %v990_v52, %v2115_v19  ;;  %v2704_v19 = vld [vmem:[#allocation7_spill] sm:$0xff] }
 0x1c9   : > { %v955_v44 = vadd.f32 %v954_v38, %v906_v34 }
 0x1ca   : > { %v1089_v28 = vpack.c.bf16 %v1066_v6, %v1065_v57  ;;  %v2710_v57 = vld [vmem:[#allocation5_spill] sm:$0xff] }
 0x1cb   : > { %v972_v31 = vmax.f32 %v955_v44, 0.0 }
 0x1cc   : > { %1425 = vmatmul.bf16.gmra.mxu1 %v1089_v28 }
 0x1cd   : > { %v988_v1 = vrot.slane %v972_v31, 7  ;;  %v1036_v55 = vrot.slane %v972_v31, 1  ;;  %v1091_v42 = vpack.c.bf16 %v972_v31, %v971_v54  ;;  %v2709_v54 = vld [vmem:[#allocation6_spill] sm:$0xff] }
 0x1cf   : > { %1381 = vmatmul.bf16.gmra.mxu0 %v1091_v42  ;;  %v1004_v15 = vsel %vm348_vm0, %v988_v1, %v2702_v35  ;;  %v1037_v14 = vsel %vm477_vm1, %v1035_v56, %v1036_v55  ;;  %v1052_v62 = vsel %vm477_vm1, %v1036_v55, %v2703_v9  ;;  %v989_v18 = vsel %vm348_vm0, %v987_v53, %v988_v1 }
 0x1d0   : > { %v1005_v32 = vmul.f32 %v1004_v15, %v2213_v33  ;;  %v1067_v13 = vmul.f32 %v1037_v14, %v2704_v19  ;;  %v1068_v41 = vmul.f32 %v1052_v62, %v2705_v7  ;;  %v1020_v10 = vmul.f32 %v989_v18, %v2706_v46 }
 0x1d2   : > { %v1069_v29 = vpack.c.bf16 %v1006_v48, %v1005_v32  ;;  %v1092_v61 = vpack.c.bf16 %v1068_v41, %v1067_v13  ;;  %v1090_v63 = vpack.c.bf16 %v1020_v10, %v1019_v3  ;;  %v2711_v3 = vld [vmem:[#allocation8_spill] sm:$0xff]  ;;  %v2712_v13 = vld [vmem:[#allocation10_spill] sm:$0xff] }
 0x1d4   : > { %1297 = vmatmul.bf16.vlgmr.msrb.gmra.mxu3 %v1069_v29 }
 0x1dc   : > { %1430 = vmatmul.bf16.gmra.mxu1 %v1092_v61  ;;  %v1347_v60 = vpop.f32.mrf.mxu0 }
 0x1e4   : > { %1302 = vmatmul.bf16.gmra.mxu3 %v1072_v50  ;;  %v1349_v49 = vpop.f32.mrf.mxu0 }
 0x1e9   : > { %v1396_v33 = vpop.f32.mrf.mxu1 }
 0x1ec   : > { %v1352_v27 = vpop.f32.mrf.mxu0 }
 0x1f1   : > { %v1398_v20 = vpop.f32.mrf.mxu1 }
 0x1f4   : > { %1307 = vmatmul.bf16.gmra.mxu3 %v1075_v40  ;;  %v1354_v4 = vpop.f32.mrf.mxu0 }
 0x1f9   : > { %v1401_v50 = vpop.f32.mrf.mxu1 }
 0x1fc   : > { %v1357_v43 = vpop.f32.mrf.mxu0 }
 0x204   : > { %1312 = vmatmul.bf16.gmra.mxu3 %v1078_v45  ;;  %v1403_v45 = vpop.f32.mrf.mxu1  ;;  %v1359_v2 = vpop.f32.mrf.mxu0 }
 0x20c   : > { %v1406_v23 = vpop.f32.mrf.mxu1  ;;  %v1362_v44 = vpop.f32.mrf.mxu0 }
 0x214   : > { %1317 = vmatmul.bf16.gmra.mxu3 %v1081_v16  ;;  %v1408_v53 = vpop.f32.mrf.mxu1  ;;  %v1364_v62 = vpop.f32.mrf.mxu0 }
 0x21c   : > { %v1411_v55 = vpop.f32.mrf.mxu1  ;;  %v1367_v61 = vpop.f32.mrf.mxu0 }
 0x224   : > { %1322 = vmatmul.bf16.gmra.mxu3 %v1084_v26  ;;  %v1413_v32 = vpop.f32.mrf.mxu1 }
 0x234   : > { %1327 = vmatmul.bf16.gmra.mxu3 %v1087_v37 }
 0x244   : > { %1332 = vmatmul.bf16.gmra.mxu3 %v1090_v63 }
 0x257   : > { %v1298_v30 = vpop.f32.mrf.mxu3 }
 0x258   : > { %v1299_v40 = vadd.f32 %v2612_v24, %v1298_v30 }
 0x25a   : > { %v1348_v21 = vadd.f32 %v1347_v60, %v1299_v40  ;;  %v1416_v60 = vpop.f32.mrf.mxu1 }
 0x25c   : > { %v1397_v12 = vadd.f32 %v1396_v33, %v1348_v21  ;;  %v2713_v33 = vld [vmem:[#allocation11_spill] sm:$0xff]  ;;  %v1821_v21 = vld [vmem:[%s2038_s16 + $0x38] sm:$0xff] }
 0x25e   : > { %v1436_v16 = vadd.f32 %v1397_v12, %v2707_v36 }
 0x25f   : > { %v1300_v22 = vpop.f32.mrf.mxu3 }
 0x260   : > { %v1452_v5 = vmax.f32 %v1436_v16, 0.0  ;;  %v1301_v26 = vadd.f32 %v2612_v24, %v1300_v22 }
 0x262   : > { %1468 = vst [vmem:[%s2621_s12] sm:$0xff] %v1452_v5  ;;  %v1350_v8 = vadd.f32 %v1349_v49, %v1301_v26  ;;  %v1418_v12 = vpop.f32.mrf.mxu1 }
 0x264   : > { %v1399_v17 = vadd.f32 %v1398_v20, %v1350_v8  ;;  %v1822_v8 = vld [vmem:[%s2038_s16 + $0x40] sm:$0xff] }
 0x266   : > { %v1437_v59 = vadd.f32 %v1399_v17, %v2708_v25 }
 0x267   : > { %v1303_v58 = vpop.f32.mrf.mxu3 }
 0x268   : > { %v1453_v11 = vmax.f32 %v1437_v59, 0.0  ;;  %v1304_v39 = vadd.f32 %v2612_v24, %v1303_v58 }
 0x26a   : > { %1469 = vst [vmem:[%s2621_s12 + $0x8] sm:$0xff] %v1453_v11  ;;  %v1353_v51 = vadd.f32 %v1352_v27, %v1304_v39  ;;  %v1421_v58 = vpop.f32.mrf.mxu1 }
 0x26c   : > { %v1402_v37 = vadd.f32 %v1401_v50, %v1353_v51  ;;  %v1823_v51 = vld [vmem:[%s2038_s16 + $0x48] sm:$0xff] }
 0x26e   : > { %v1438_v0 = vadd.f32 %v1402_v37, %v2709_v54 }
 0x26f   : > { %v1305_v56 = vpop.f32.mrf.mxu3 }
 0x270   : > { %v1454_v34 = vmax.f32 %v1438_v0, 0.0  ;;  %v1306_v47 = vadd.f32 %v2612_v24, %v1305_v56 }
 0x272   : > { %1470 = vst [vmem:[%s2621_s12 + $0x10] sm:$0xff] %v1454_v34  ;;  %v1355_v52 = vadd.f32 %v1354_v4, %v1306_v47  ;;  %v1369_v4 = vpop.f32.mrf.mxu0  ;;  %v1423_v34 = vpop.f32.mrf.mxu1 }
 0x274   : > { %v1404_v38 = vadd.f32 %v1403_v45, %v1355_v52  ;;  %v1824_v52 = vld [vmem:[%s2038_s16 + $0x50] sm:$0xff] }
 0x276   : > { %v1439_v6 = vadd.f32 %v1404_v38, %v2710_v57 }
 0x277   : > { %v1308_v28 = vpop.f32.mrf.mxu3 }
 0x278   : > { %v1455_v31 = vmax.f32 %v1439_v6, 0.0  ;;  %v1309_v1 = vadd.f32 %v2612_v24, %v1308_v28 }
 0x27a   : > { %1471 = vst [vmem:[%s2621_s12 + $0x18] sm:$0xff] %v1455_v31  ;;  %v1358_v42 = vadd.f32 %v1357_v43, %v1309_v1  ;;  %v1372_v17 = vpop.f32.mrf.mxu0 }
 0x27c   : > { %v1407_v48 = vadd.f32 %v1406_v23, %v1358_v42  ;;  %v1825_v42 = vld [vmem:[%s2038_s16 + $0x58] sm:$0xff] }
 0x27e   : > { %v1440_v35 = vadd.f32 %v1407_v48, %v2711_v3 }
 0x27f   : > { %v1310_v15 = vpop.f32.mrf.mxu3 }
 0x280   : > { %v1456_v14 = vmax.f32 %v1440_v35, 0.0  ;;  %v1311_v9 = vadd.f32 %v2612_v24, %v1310_v15 }
 0x282   : > { %1472 = vst [vmem:[%s2621_s12 + $0x20] sm:$0xff] %v1456_v14  ;;  %v1360_v18 = vadd.f32 %v1359_v2, %v1311_v9 }
 0x284   : > { %v1409_v19 = vadd.f32 %v1408_v53, %v1360_v18  ;;  %v1374_v53 = vpop.f32.mrf.mxu0  ;;  %v1826_v18 = vld [vmem:[%s2038_s16 + $0x60] sm:$0xff] }
 0x286   : > { %v1441_v7 = vadd.f32 %v1409_v19, %v2712_v13 }
 0x287   : > { %v1313_v41 = vpop.f32.mrf.mxu3 }
 0x288   : > { %v1457_v46 = vmax.f32 %v1441_v7, 0.0  ;;  %v1314_v10 = vadd.f32 %v2612_v24, %v1313_v41 }
 0x28a   : > { %1473 = vst [vmem:[%s2621_s12 + $0x28] sm:$0xff] %v1457_v46  ;;  %v1363_v29 = vadd.f32 %v1362_v44, %v1314_v10 }
 0x28c   : > { %v1412_v63 = vadd.f32 %v1411_v55, %v1363_v29  ;;  %v1377_v31 = vpop.f32.mrf.mxu0  ;;  %v1426_v55 = vpop.f32.mrf.mxu1  ;;  %v1827_v29 = vld [vmem:[%s2038_s16 + $0x68] sm:$0xff] }
 0x28e   : > { %v1442_v49 = vadd.f32 %v1412_v63, %v2713_v33 }
 0x28f   : > { %v1315_v20 = vpop.f32.mrf.mxu3 }
 0x290   : > { %v1458_v27 = vmax.f32 %v1442_v49, 0.0  ;;  %v1316_v50 = vadd.f32 %v2612_v24, %v1315_v20 }
 0x292   : > { %1474 = vst [vmem:[%s2621_s12 + $0x30] sm:$0xff] %v1458_v27  ;;  %v1365_v30 = vadd.f32 %v1364_v62, %v1316_v50 }
 0x294   : > { %v1414_v40 = vadd.f32 %v1413_v32, %v1365_v30  ;;  %v1379_v62 = vpop.f32.mrf.mxu0  ;;  %v1428_v19 = vpop.f32.mrf.mxu1  ;;  %v1828_v30 = vld [vmem:[%s2038_s16 + $0x70] sm:$0xff] }
 0x296   : > { %v1443_v45 = vadd.f32 %v1821_v21, %v1414_v40 }
 0x297   : > { %v1318_v36 = vpop.f32.mrf.mxu3 }
 0x298   : > { %v1459_v16 = vmax.f32 %v1443_v45, 0.0  ;;  %v1319_v22 = vadd.f32 %v2612_v24, %v1318_v36 }
 0x29a   : > { %1475 = vst [vmem:[%s2621_s12 + $0x38] sm:$0xff] %v1459_v16  ;;  %v1368_v5 = vadd.f32 %v1367_v61, %v1319_v22 }
 0x29c   : > { %v1417_v26 = vadd.f32 %v1416_v60, %v1368_v5  ;;  %v1382_v63 = vpop.f32.mrf.mxu0  ;;  %v1431_v20 = vpop.f32.mrf.mxu1  ;;  %v1829_v5 = vld [vmem:[%s2038_s16 + $0x78] sm:$0xff] }
 0x29e   : > { %v1444_v43 = vadd.f32 %v1822_v8, %v1417_v26 }
 0x29f   : > { %v1320_v23 = vpop.f32.mrf.mxu3 }
 0x2a0   : > { %v1460_v25 = vmax.f32 %v1444_v43, 0.0  ;;  %v1321_v59 = vadd.f32 %v2612_v24, %v1320_v23 }
 0x2a2   : > { %1476 = vst [vmem:[%s2621_s12 + $0x40] sm:$0xff] %v1460_v25  ;;  %v1370_v11 = vadd.f32 %v1369_v4, %v1321_v59 }
 0x2a4   : > { %v1419_v39 = vadd.f32 %v1418_v12, %v1370_v11  ;;  %v1384_v12 = vpop.f32.mrf.mxu0  ;;  %v1433_v16 = vpop.f32.mrf.mxu1 }
 0x2a6   : > { %v1445_v37 = vadd.f32 %v1823_v51, %v1419_v39 }
 0x2a7   : > { %v1323_v2 = vpop.f32.mrf.mxu3 }
 0x2a8   : > { %v1461_v54 = vmax.f32 %v1445_v37, 0.0  ;;  %v1324_v0 = vadd.f32 %v2612_v24, %v1323_v2 }
 0x2aa   : > { %1477 = vst [vmem:[%s2621_s12 + $0x48] sm:$0xff] %v1461_v54  ;;  %v1373_v56 = vadd.f32 %v1372_v17, %v1324_v0 }
 0x2ac   : > { %v1422_v47 = vadd.f32 %v1421_v58, %v1373_v56 }
 0x2ae   : > { %v1446_v38 = vadd.f32 %v1824_v52, %v1422_v47 }
 0x2af   : > { %v1325_v57 = vpop.f32.mrf.mxu3 }
 0x2b0   : > { %v1462_v6 = vmax.f32 %v1446_v38, 0.0  ;;  %v1326_v44 = vadd.f32 %v2612_v24, %v1325_v57 }
 0x2b2   : > { %1478 = vst [vmem:[%s2621_s12 + $0x50] sm:$0xff] %v1462_v6  ;;  %v1375_v28 = vadd.f32 %v1374_v53, %v1326_v44 }
 0x2b4   : > { %v1424_v1 = vadd.f32 %v1423_v34, %v1375_v28 }
 0x2b6   : > { %v1447_v48 = vadd.f32 %v1825_v42, %v1424_v1 }
 0x2b7   : > { %v1328_v3 = vpop.f32.mrf.mxu3 }
 0x2b8   : > { %v1463_v35 = vmax.f32 %v1447_v48, 0.0  ;;  %v1329_v15 = vadd.f32 %v2612_v24, %v1328_v3 }
 0x2ba   : > { %1479 = vst [vmem:[%s2621_s12 + $0x58] sm:$0xff] %v1463_v35  ;;  %v1378_v14 = vadd.f32 %v1377_v31, %v1329_v15 }
 0x2bc   : > { %v1427_v9 = vadd.f32 %v1426_v55, %v1378_v14 }
 0x2be   : > { %v1448_v32 = vadd.f32 %v1826_v18, %v1427_v9 }
 0x2bf   : > { %v1330_v13 = vpop.f32.mrf.mxu3 }
 0x2c0   : > { %v1464_v7 = vmax.f32 %v1448_v32, 0.0  ;;  %v1331_v41 = vadd.f32 %v2612_v24, %v1330_v13 }
 0x2c2   : > { %1480 = vst [vmem:[%s2621_s12 + $0x60] sm:$0xff] %v1464_v7  ;;  %v1380_v46 = vadd.f32 %v1379_v62, %v1331_v41 }
 0x2c4   : > { %v1429_v10 = vadd.f32 %v1428_v19, %v1380_v46 }
 0x2c6   : > { %v1449_v61 = vadd.f32 %v1827_v29, %v1429_v10 }
 0x2c7   : > { %v1333_v60 = vpop.f32.mrf.mxu3 }
 0x2c8   : > { %v1465_v33 = vmax.f32 %v1449_v61, 0.0  ;;  %v1334_v49 = vadd.f32 %v2612_v24, %v1333_v60 }
 0x2ca   : > { %1481 = vst [vmem:[%s2621_s12 + $0x68] sm:$0xff] %v1465_v33  ;;  %v1383_v27 = vadd.f32 %v1382_v63, %v1334_v49 }
 0x2cc   : > { %v1432_v50 = vadd.f32 %v1431_v20, %v1383_v27 }
 0x2ce   : > { %v1450_v40 = vadd.f32 %v1828_v30, %v1432_v50 }
 0x2cf   : > { %v1335_v4 = vpop.f32.mrf.mxu3 }
 0x2d0   : > { %v1466_v21 = vmax.f32 %v1450_v40, 0.0  ;;  %v1336_v45 = vadd.f32 %v2612_v24, %v1335_v4 }
 0x2d2   : > { %1482 = vst [vmem:[%s2621_s12 + $0x70] sm:$0xff] %v1466_v21  ;;  %v1385_v36 = vadd.f32 %v1384_v12, %v1336_v45 }
 0x2d4   : > { %v1434_v22 = vadd.f32 %v1433_v16, %v1385_v36 }
 0x2d6   : > { %v1451_v26 = vadd.f32 %v1829_v5, %v1434_v22 }
 0x2d8   : > { %v1467_v8 = vmax.f32 %v1451_v26, 0.0 }
 0x2da   : > { %1483 = vst [vmem:[%s2621_s12 + $0x78] sm:$0xff] %v1467_v8 }
 0x2db PF: > { %s17_s24 = sadd.s32 1, %s1836_s24  }
 0x2dc   : > { %p14_p4 = scmp.ge.s32.totalorder %s17_s24, 4  }
 0x2de   :  { %16 = sbr.rel (!%p14_p4) target bundleno = 1 (0x1), region = 78 }

</bundles_post_ra>
